<compile_context>
chip_gen: v7x
topology: tpu7x:2x2x1
jax: 0.10.0
libtpu: 0.0.40
codegen_flags: <defaults>
</compile_context>

<pallas_src>
import jax
import jax.numpy as jnp
from jax.experimental import pallas as pl
from jax.experimental.pallas import tpu as pltpu


def _postprocess_kernel(size_ref, logits0_ref, boxes_ref, refers_ref, out_ref):
    # size_ref: SMEM f32[2] = (img_h, img_w)
    img_h = size_ref[0]
    img_w = size_ref[1]

    # ---- boxes: cxcywh -> xyxy, scaled by (img_w, img_h, img_w, img_h) ----
    b = boxes_ref[...].astype(jnp.float32)        # [4, N], rows = cx, cy, w, h
    cx = b[0:1, :]
    cy = b[1:2, :]
    w = b[2:3, :]
    h = b[3:4, :]
    out_ref[0:1, :] = (cx - 0.5 * w) * img_w      # x1
    out_ref[1:2, :] = (cy - 0.5 * h) * img_h      # y1
    out_ref[2:3, :] = (cx + 0.5 * w) * img_w      # x2
    out_ref[3:4, :] = (cy + 0.5 * h) * img_h      # y2

    # ---- scores = sigmoid(pred_logits[..., 0]) ----
    out_ref[4:5, :] = jax.nn.sigmoid(logits0_ref[...].astype(jnp.float32))  # [1, N]

    # ---- refers = sigmoid(pred_refers).max(-1) (sublane reduce over R) ----
    r = jax.nn.sigmoid(refers_ref[...].astype(jnp.float32))                 # [R, N]
    out_ref[5:6, :] = jnp.max(r, axis=0, keepdims=True)                     # [1, N]


def tracker_post_process(pred_logits, pred_boxes, pred_refers, target_size):
    """Pallas-backed equivalent of TrackerPostProcess.forward.

    Args:
      pred_logits: [N, C] (float32 or bf16)
      pred_boxes:  [N, 4] (cx, cy, w, h), normalized
      pred_refers: [N, R]
      target_size: (img_h, img_w)
    Returns:
      dict with 'boxes' [N,4] (xyxy, scaled), 'scores' [N], 'labels' [N],
      'refers' [N].  (pred_* tensors are "removed", i.e. not returned.)
    """
    N = pred_logits.shape[0]
    img_h, img_w = target_size

    # Wrapper-side layout plumbing: put the query axis on the lane dimension.
    logits0 = pred_logits[:, 0][None, :]          # [1, N]  (only class 0 is used)
    boxes_t = pred_boxes.T                        # [4, N]
    refers_t = pred_refers.T                      # [R, N]
    size = jnp.asarray([img_h, img_w], dtype=jnp.float32)   # SMEM scalars

    vmem = pl.BlockSpec(memory_space=pltpu.MemorySpace.VMEM)
    smem = pl.BlockSpec(memory_space=pltpu.MemorySpace.SMEM)

    slab = pl.pallas_call(
        _postprocess_kernel,
        out_shape=jax.ShapeDtypeStruct((6, N), jnp.float32),
        in_specs=[smem, vmem, vmem, vmem],
        out_specs=vmem,
    )(size, logits0, boxes_t, refers_t)

    scores = slab[4, :]
    return {
        "boxes": slab[0:4, :].T,                  # [N, 4]
        "scores": scores,                         # [N]
        "labels": jnp.zeros_like(scores),         # torch.full_like(scores, 0)
        "refers": slab[5, :],                     # [N]
    }


def _reference(pred_logits, pred_boxes, pred_refers, target_size):
    img_h, img_w = target_size
    scores = jax.nn.sigmoid(pred_logits[..., 0])
    refers = jnp.max(jax.nn.sigmoid(pred_refers), axis=-1)
    cx, cy, w, h = (pred_boxes[:, 0], pred_boxes[:, 1],
                    pred_boxes[:, 2], pred_boxes[:, 3])
    boxes = jnp.stack([cx - 0.5 * w, cy - 0.5 * h, cx + 0.5 * w, cy + 0.5 * h], axis=-1)
    scale = jnp.asarray([img_w, img_h, img_w, img_h], dtype=jnp.float32)
    boxes = boxes * scale[None, :]
    return {"boxes": boxes, "scores": scores,
            "labels": jnp.zeros_like(scores), "refers": refers}


if __name__ == "__main__":
    key = jax.random.PRNGKey(0)
    k1, k2, k3 = jax.random.split(key, 3)

    N, C, R = 16, 4, 2             # num_queries, num_classes, refer dim
    target_size = (480.0, 640.0)   # (img_h, img_w)

    pred_logits = jax.random.normal(k1, (N, C), dtype=jnp.float32)
    pred_boxes = jax.nn.sigmoid(jax.random.normal(k2, (N, 4), dtype=jnp.float32))
    pred_refers = jax.random.normal(k3, (N, R), dtype=jnp.float32)

    out = tracker_post_process(pred_logits, pred_boxes, pred_refers, target_size)
    jax.block_until_ready(out)

    ref = _reference(pred_logits, pred_boxes, pred_refers, target_size)
    for k in ("boxes", "scores", "labels", "refers"):
        assert out[k].shape == ref[k].shape, (k, out[k].shape, ref[k].shape)
        assert jnp.allclose(out[k], ref[k], atol=1e-5, rtol=1e-5), k

    print("KERNEL_OK")
</pallas_src>

<mosaic_0001>
module attributes {stable_mosaic.version = 11 : i64} {
  func.func @_postprocess_kernel(%arg0: memref<2xf32, #tpu.memory_space<smem>>, %arg1: memref<1x16xf32, #tpu.memory_space<vmem>>, %arg2: memref<4x16xf32, #tpu.memory_space<vmem>>, %arg3: memref<2x16xf32, #tpu.memory_space<vmem>>, %arg4: memref<6x16xf32, #tpu.memory_space<vmem>>) attributes {dimension_semantics = [], scalar_prefetch = 0 : i64, scratch_operands = 0 : i64, tpu.core_type = #tpu.core_type<tc>} {
    %c0 = arith.constant 0 : index
    %0 = memref.load %arg0[%c0] : memref<2xf32, #tpu.memory_space<smem>>
    %c1 = arith.constant 1 : index
    %1 = memref.load %arg0[%c1] : memref<2xf32, #tpu.memory_space<smem>>
    %c0_0 = arith.constant 0 : index
    %c0_1 = arith.constant 0 : index
    %2 = vector.load %arg2[%c0_0, %c0_1] : memref<4x16xf32, #tpu.memory_space<vmem>>, vector<4x16xf32>
    %3 = vector.extract_strided_slice %2 {offsets = [0, 0], sizes = [1, 16], strides = [1, 1]} : vector<4x16xf32> to vector<1x16xf32>
    %4 = vector.extract_strided_slice %2 {offsets = [1, 0], sizes = [1, 16], strides = [1, 1]} : vector<4x16xf32> to vector<1x16xf32>
    %5 = vector.extract_strided_slice %2 {offsets = [2, 0], sizes = [1, 16], strides = [1, 1]} : vector<4x16xf32> to vector<1x16xf32>
    %6 = vector.extract_strided_slice %2 {offsets = [3, 0], sizes = [1, 16], strides = [1, 1]} : vector<4x16xf32> to vector<1x16xf32>
    %cst = arith.constant 5.000000e-01 : f32
    %7 = vector.broadcast %cst : f32 to vector<1x16xf32>
    %8 = arith.mulf %7, %5 : vector<1x16xf32>
    %9 = arith.subf %3, %8 : vector<1x16xf32>
    %10 = vector.broadcast %1 : f32 to vector<1x16xf32>
    %11 = arith.mulf %9, %10 : vector<1x16xf32>
    %c0_2 = arith.constant 0 : index
    %c0_3 = arith.constant 0 : index
    %12 = vector.load %arg4[%c0_2, %c0_3] : memref<6x16xf32, #tpu.memory_space<vmem>>, vector<1x16xf32>
    tpu.vector_store %arg4[%c0_2, %c0_3], %11 {strides = array<i32>} : memref<6x16xf32, #tpu.memory_space<vmem>>, vector<1x16xf32>,
    %cst_4 = arith.constant 5.000000e-01 : f32
    %13 = vector.broadcast %cst_4 : f32 to vector<1x16xf32>
    %14 = arith.mulf %13, %6 : vector<1x16xf32>
    %15 = arith.subf %4, %14 : vector<1x16xf32>
    %16 = vector.broadcast %0 : f32 to vector<1x16xf32>
    %17 = arith.mulf %15, %16 : vector<1x16xf32>
    %c1_5 = arith.constant 1 : index
    %c0_6 = arith.constant 0 : index
    %18 = vector.load %arg4[%c1_5, %c0_6] : memref<6x16xf32, #tpu.memory_space<vmem>>, vector<1x16xf32>
    tpu.vector_store %arg4[%c1_5, %c0_6], %17 {strides = array<i32>} : memref<6x16xf32, #tpu.memory_space<vmem>>, vector<1x16xf32>,
    %cst_7 = arith.constant 5.000000e-01 : f32
    %19 = vector.broadcast %cst_7 : f32 to vector<1x16xf32>
    %20 = arith.mulf %19, %5 : vector<1x16xf32>
    %21 = arith.addf %3, %20 : vector<1x16xf32>
    %22 = vector.broadcast %1 : f32 to vector<1x16xf32>
    %23 = arith.mulf %21, %22 : vector<1x16xf32>
    %c2 = arith.constant 2 : index
    %c0_8 = arith.constant 0 : index
    %24 = vector.load %arg4[%c2, %c0_8] : memref<6x16xf32, #tpu.memory_space<vmem>>, vector<1x16xf32>
    tpu.vector_store %arg4[%c2, %c0_8], %23 {strides = array<i32>} : memref<6x16xf32, #tpu.memory_space<vmem>>, vector<1x16xf32>,
    %cst_9 = arith.constant 5.000000e-01 : f32
    %25 = vector.broadcast %cst_9 : f32 to vector<1x16xf32>
    %26 = arith.mulf %25, %6 : vector<1x16xf32>
    %27 = arith.addf %4, %26 : vector<1x16xf32>
    %28 = vector.broadcast %0 : f32 to vector<1x16xf32>
    %29 = arith.mulf %27, %28 : vector<1x16xf32>
    %c3 = arith.constant 3 : index
    %c0_10 = arith.constant 0 : index
    %30 = vector.load %arg4[%c3, %c0_10] : memref<6x16xf32, #tpu.memory_space<vmem>>, vector<1x16xf32>
    tpu.vector_store %arg4[%c3, %c0_10], %29 {strides = array<i32>} : memref<6x16xf32, #tpu.memory_space<vmem>>, vector<1x16xf32>,
    %c0_11 = arith.constant 0 : index
    %c0_12 = arith.constant 0 : index
    %31 = vector.load %arg1[%c0_11, %c0_12] : memref<1x16xf32, #tpu.memory_space<vmem>>, vector<1x16xf32>
    %32 = arith.negf %31 : vector<1x16xf32>
    %33 = math.exp %32 : vector<1x16xf32>
    %cst_13 = arith.constant 1.000000e+00 : f32
    %34 = vector.broadcast %cst_13 : f32 to vector<1x16xf32>
    %35 = arith.addf %34, %33 : vector<1x16xf32>
    %36 = arith.divf %34, %35 : vector<1x16xf32>
    %c4 = arith.constant 4 : index
    %c0_14 = arith.constant 0 : index
    %37 = vector.load %arg4[%c4, %c0_14] : memref<6x16xf32, #tpu.memory_space<vmem>>, vector<1x16xf32>
    tpu.vector_store %arg4[%c4, %c0_14], %36 {strides = array<i32>} : memref<6x16xf32, #tpu.memory_space<vmem>>, vector<1x16xf32>,
    %c0_15 = arith.constant 0 : index
    %c0_16 = arith.constant 0 : index
    %38 = vector.load %arg3[%c0_15, %c0_16] : memref<2x16xf32, #tpu.memory_space<vmem>>, vector<2x16xf32>
    %39 = arith.negf %38 : vector<2x16xf32>
    %40 = math.exp %39 : vector<2x16xf32>
    %cst_17 = arith.constant 1.000000e+00 : f32
    %41 = vector.broadcast %cst_17 : f32 to vector<2x16xf32>
    %42 = arith.addf %41, %40 : vector<2x16xf32>
    %43 = arith.divf %41, %42 : vector<2x16xf32>
    %cst_18 = arith.constant dense<0xFF800000> : vector<16xf32>
    %44 = vector.multi_reduction <maximumf>, %43, %cst_18 [0] : vector<2x16xf32> to vector<16xf32>
    %45 = vector.shape_cast %44 : vector<16xf32> to vector<1x16xf32>
    %c5 = arith.constant 5 : index
    %c0_19 = arith.constant 0 : index
    %46 = vector.load %arg4[%c5, %c0_19] : memref<6x16xf32, #tpu.memory_space<vmem>>, vector<1x16xf32>
    tpu.vector_store %arg4[%c5, %c0_19], %45 {strides = array<i32>} : memref<6x16xf32, #tpu.memory_space<vmem>>, vector<1x16xf32>,
    return
  }
}

</mosaic_0001>

<bundles_post_ra>
// kernel: tpu_custom_call.1
= control target key start
LH: loop header
LB: loop body
LE: loop exit
PB: predicated region body
PF: predicated region fallthrough
CT: control target
= control target key end

     0   :  { %9 = vsyncpa [#allocation4], 0  ;;  %s202_s0 = inlined_call_operand.hbm [shape: f32[2], index: 0, kind: input, shape index: {}]   ;;  %s203_s1 = inlined_call_operand.vmem [shape: f32[1,16], index: 1, kind: input, shape index: {}]   ;;  %s204_s2 = inlined_call_operand.vmem [shape: f32[4,16], index: 2, kind: input, shape index: {}]   ;;  %s205_s3 = inlined_call_operand.vmem [shape: f32[2,16], index: 3, kind: input, shape index: {}]   ;;  %s206_s4 = inlined_call_operand.hbm [shape: f32[6,16], index: 4, kind: output, shape index: {}]  }
   0x1   :  { %10 = vsyncpa [#allocation3], 0  ;;  %s102_s17 = scalar_lea.hbm %s202_s0, 16 }
   0x2   :  { %p103_p0 = scmp.ne.s32.totalorder %s202_s0, %s102_s17  ;;  %p106_p1 = scmp.lt.u32.totalorder %s102_s17, %s202_s0 }
   0x4   :  { %p108_p2 = pnand %p106_p1, %p103_p0 }
   0x6   :  { %111 = shalt.err (!%p108_p2)
}
   0x7   :  { %s138_s22 = smov [#allocation2]  }
   0x8   :  { %18 = dma.hbm_to_smem %s202_s0, 16, %s138_s22, [#allocation4]  }
   0x9   :  { %134 = dma.done.wait [#allocation4], 16  }
   0xa   :  { %135 = vsyncadd [#allocation4], 4294967280 }
   0xb   :  { %28 = sfence }
   0xc   :  { %s89_s25 = sld [smem:[#allocation2 + $0x1]]  ;;  %v31_v0 = vld [vmem:[%s204_s2] sm:$0xf]  ;;  %s29_s28 = sld [smem:[#allocation2]]  ;;  %vm39_vm0 = vcmask 122880   ;;  %vm43_vm1 = vcmask 123905  }
   0xd   :  { %v32_v1 = vmul.f32 0.5, %v31_v0  ;;  %v50_v2 = vld [vmem:[%s203_s1] sm:$0x1]  ;;  %vm65_vm2 = vcmask 123904   ;;  %s139_s0 = smov [#allocation5]  }
   0xe   :  { %v90_v3 = vmul.f32 -1.442695, %v50_v2  ;;  %v58_v4 = vld [vmem:[%s205_s3] sm:$0x3]  ;;  %s80_s1 = sshll.u32 %s139_s0, 4  ;;  %s81_s1 = int_to_ptr.vmem [resolvable:$true] %s80_s1 }
   0xf   :  { %v34_v5 = vrot.slane %v32_v1, 2  ;;  %v91_v6 = vmul.f32 -1.442695, %v58_v4  ;;  %s112_s2 = scalar_lea.vmem %s81_s1, 128  ;;  %p117_p4 = scmp.lt.s32.totalorder %s81_s1, %s81_s1 }
  0x10   :  { %94 = vpow2.f32 %v90_v3  ;;  %p113_p3 = scmp.ne.s32.totalorder %s81_s1, %s112_s2  ;;  %p118_p5 = scmp.lt.s32.totalorder %s112_s2, %s112_s2 }
  0x11   :  { %v36_v7 = vsub.f32 %v31_v0, %v34_v5  ;;  %v45_v8 = vadd.f32 %v34_v5, %v31_v0  ;;  %96 = vpow2.f32 %v91_v6 }
  0x12   :  { %v37_v9 = vstv %s89_s25  ;;  %v41_v11 = vstv %s29_s28  ;;  %p119_p6 = por %p118_p5, %p117_p4 }
  0x13   :  { %v38_v10 = vmul.f32 %v37_v9, %v36_v7  ;;  %v46_v12 = vmul.f32 %v45_v8, %v37_v9  ;;  %v42_v13 = vmul.f32 %v41_v11, %v36_v7  ;;  %v48_v14 = vmul.f32 %v45_v8, %v41_v11 }
  0x14   :  { %p120_p7 = pnand %p119_p6, %p113_p3 }
  0x15   :  { %40 = vst.msk [vmem:[#allocation5] sm:$0x1] %vm39_vm0, %v38_v10  ;;  %47 = vst.msk [vmem:[#allocation5 + $0x2] sm:$0x1] %vm39_vm0, %v46_v12 }
  0x16   :  { %44 = vst.msk [vmem:[#allocation5] sm:$0x2] %vm43_vm1, %v42_v13  ;;  %49 = vst.msk [vmem:[#allocation5 + $0x2] sm:$0x2] %vm43_vm1, %v48_v14 }
  0x1a   :  { %v95_v15 = vpop.eup %94 }
  0x1b   :  { %v97_v16 = vpop.eup %96  ;;  %v54_v17 = vadd.f32 1.0, %v95_v15 }
  0x1c   :  { %v62_v18 = vadd.f32 1.0, %v97_v16 }
  0x1d   :  { %98 = vrcp.f32 %v54_v17 }
  0x1e   :  { %100 = vrcp.f32 %v62_v18 }
  0x27   :  { %v99_v19 = vpop.eup %98 }
  0x28   :  { %v101_v20 = vpop.eup %100  ;;  %57 = vst.msk [vmem:[#allocation5 + $0x4] sm:$0x1] %vm39_vm0, %v99_v19 }
  0x29   :  { %v66_v21 = vsel %vm65_vm2, %v101_v20, -inf }
  0x2a   :  { %v67_v22 = vrot.slane %v66_v21, 4 }
  0x2c   :  { %v68_v23 = vmax.f32 %v66_v21, %v67_v22 }
  0x2e   :  { %v69_v24 = vrot.slane %v68_v23, 2 }
  0x30   :  { %v70_v25 = vmax.f32 %v68_v23, %v69_v24 }
  0x32   :  { %v71_v26 = vrot.slane %v70_v25, 1 }
  0x34   :  { %v72_v27 = vmax.f32 %v70_v25, %v71_v26 }
  0x36   :  { %73 = vst.msk [vmem:[#allocation5 + $0x5] sm:$0x1] %vm39_vm0, %v72_v27 }
  0x37   :  { %123 = shalt.err (!%p120_p7)
}
  0x38   :  { %s124_s8 = scalar_lea.hbm %s206_s4, 128 }
  0x39   :  { %p125_p8 = scmp.ne.s32.totalorder %s206_s4, %s124_s8  ;;  %p128_p9 = scmp.lt.u32.totalorder %s124_s8, %s206_s4 }
  0x3b   :  { %p130_p10 = pnand %p128_p9, %p125_p8 }
  0x3d   :  { %133 = shalt.err (!%p130_p10)
}
  0x3e   :  { %83 = dma.vmem_to_hbm [thread:$0]  %s81_s1, 128, %s206_s4, [#allocation3]  }
  0x3f   :  { %136 = dma.done.wait [#allocation3], 128  }
  0x40   :  { %137 = vsyncadd [#allocation3], 4294967168 }
  0x41   :  { %87 = vsyncpa [#allocation3], 1 }
  0x42   :  { %88 = vsyncpa [#allocation4], 1 }

</bundles_post_ra>
